<compile_context>
chip_gen: v5e
topology: v5e:2x2
jax: 0.10.0
libtpu: 0.0.40
codegen_flags: <defaults>
</compile_context>

<pallas_src>
import jax
import jax.numpy as jnp
from jax.experimental import pallas as pl
from jax.experimental.pallas import tpu as pltpu


def _enc_dec_kernel(x_ref, weT_ref, be_ref, wdT_ref, bd_ref, o_ref):
    # x_ref:   (C_in, TL)   -- channels on sublanes, spatial pixels on lanes
    # weT_ref: (C_hid, C_in), be_ref: (C_hid, 1)
    # wdT_ref: (C_out, C_hid), bd_ref: (C_out, 1)
    x = x_ref[...]
    # encoder: 1x1 conv == channel-mixing matmul, then ReLU (bias/ReLU in f32)
    h = jnp.dot(weT_ref[...], x, preferred_element_type=jnp.float32) + be_ref[...]
    h = jnp.maximum(h, 0.0)
    # decoder: project back to C_out channels
    y = jnp.dot(wdT_ref[...], h, preferred_element_type=jnp.float32) + bd_ref[...]
    o_ref[...] = y.astype(o_ref.dtype)   # lane-dense (TL multiple of 128) store


def _pick_tile(s_pad, tl_max):
    """Largest multiple of 128 that divides s_pad and is <= tl_max."""
    best = 128
    t = 128
    limit = min(max(tl_max, 128), s_pad)
    while t <= limit:
        if s_pad % t == 0:
            best = t
        t += 128
    return best


def vision_module_forward(x_nchw, we, be, wd, bd, *, tl_max=2048):
    """x_nchw: (N, C, H, W).  Returns (N, C_out, H, W)."""
    N, C, H, W = x_nchw.shape
    C_hid = we.shape[1]
    C_out = wd.shape[1]
    S = H * W

    # Free reshape: NCHW consumed directly, spatial flattened onto the lane axis.
    x3 = x_nchw.reshape(N, C, S)

    # Pad spatial to a lane multiple if needed (handles arbitrary H*W).
    S_pad = ((S + 127) // 128) * 128
    if S_pad != S:
        x3 = jnp.pad(x3, ((0, 0), (0, 0), (0, S_pad - S)))

    TL = _pick_tile(S_pad, tl_max)

    # Tiny weight tensors, pre-transposed so the kernel computes W^T @ x.
    weT = jnp.transpose(we)          # (C_hid, C)
    wdT = jnp.transpose(wd)          # (C_out, C_hid)
    be2 = be.reshape(C_hid, 1)
    bd2 = bd.reshape(C_out, 1)

    out3 = pl.pallas_call(
        _enc_dec_kernel,
        out_shape=jax.ShapeDtypeStruct((N, C_out, S_pad), x3.dtype),
        grid_spec=pltpu.PrefetchScalarGridSpec(
            num_scalar_prefetch=0,
            grid=(N, S_pad // TL),
            in_specs=[
                pl.BlockSpec((None, C, TL), lambda n, s: (n, 0, s)),
                pl.BlockSpec((C_hid, C), lambda n, s: (0, 0)),
                pl.BlockSpec((C_hid, 1), lambda n, s: (0, 0)),
                pl.BlockSpec((C_out, C_hid), lambda n, s: (0, 0)),
                pl.BlockSpec((C_out, 1), lambda n, s: (0, 0)),
            ],
            out_specs=pl.BlockSpec((None, C_out, TL), lambda n, s: (n, 0, s)),
        ),
        compiler_params=pltpu.CompilerParams(
            dimension_semantics=("parallel", "parallel")
        ),
    )(x3, weT, be2, wdT, bd2)

    if S_pad != S:
        out3 = out3[:, :, :S]
    return out3.reshape(N, C_out, H, W)


def _reference(x_nchw, we, be, wd, bd):
    x = jnp.transpose(x_nchw, (0, 2, 3, 1))
    h = jnp.maximum(jnp.einsum("nhwc,cd->nhwd", x, we) + be, 0.0)
    y = jnp.einsum("nhwd,de->nhwe", h, wd) + bd
    return jnp.transpose(y, (0, 3, 1, 2))


if __name__ == "__main__":
    key = jax.random.PRNGKey(0)
    k_x, k_we, k_be, k_wd, k_bd = jax.random.split(key, 5)

    N, C, H, W = 2, 4, 16, 16   # small shapes: batch=2, channels=4, spatial=16
    C_hid = 32                  # hidden=32

    x = jax.random.normal(k_x, (N, C, H, W), dtype=jnp.float32)
    we = jax.random.normal(k_we, (C, C_hid), dtype=jnp.float32) * 0.1
    be = jax.random.normal(k_be, (C_hid,), dtype=jnp.float32) * 0.1
    wd = jax.random.normal(k_wd, (C_hid, C), dtype=jnp.float32) * 0.1
    bd = jax.random.normal(k_bd, (C,), dtype=jnp.float32) * 0.1

    out = vision_module_forward(x, we, be, wd, bd)
    out = jax.block_until_ready(out)

    ref = _reference(x, we, be, wd, bd)
    assert out.shape == (N, C, H, W)
    assert jnp.allclose(out, ref, atol=1e-5, rtol=1e-5)

    print("KERNEL_OK")
</pallas_src>

<mosaic_0001>
module attributes {stable_mosaic.version = 11 : i64} {
  func.func @_enc_dec_kernel(%arg0: i32, %arg1: i32, %arg2: memref<1x4x256xf32, #tpu.memory_space<vmem>>, %arg3: memref<32x4xf32, #tpu.memory_space<vmem>>, %arg4: memref<32x1xf32, #tpu.memory_space<vmem>>, %arg5: memref<4x32xf32, #tpu.memory_space<vmem>>, %arg6: memref<4x1xf32, #tpu.memory_space<vmem>>, %arg7: memref<1x4x256xf32, #tpu.memory_space<vmem>>) attributes {dimension_semantics = [#tpu.dimension_semantics<parallel>, #tpu.dimension_semantics<parallel>], iteration_bounds = array<i64: 2, 1>, scalar_prefetch = 0 : i64, scratch_operands = 0 : i64, tpu.core_type = #tpu.core_type<tc>, window_params = [{transform_indices = @transform_0, window_bounds = array<i64: 1, 4, 256>}, {pipeline_mode = #tpu.pipeline_mode<synchronous>, transform_indices = @transform_1, window_bounds = array<i64: 32, 4>}, {pipeline_mode = #tpu.pipeline_mode<synchronous>, transform_indices = @transform_2, window_bounds = array<i64: 32, 1>}, {pipeline_mode = #tpu.pipeline_mode<synchronous>, transform_indices = @transform_3, window_bounds = array<i64: 4, 32>}, {pipeline_mode = #tpu.pipeline_mode<synchronous>, transform_indices = @transform_4, window_bounds = array<i64: 4, 1>}, {transform_indices = @transform_5, window_bounds = array<i64: 1, 4, 256>}]} {
    %c0 = arith.constant 0 : index
    %c0_0 = arith.constant 0 : index
    %c0_1 = arith.constant 0 : index
    %0 = vector.load %arg2[%c0, %c0_0, %c0_1] : memref<1x4x256xf32, #tpu.memory_space<vmem>>, vector<1x4x256xf32>
    %1 = vector.shape_cast %0 : vector<1x4x256xf32> to vector<4x256xf32>
    %c0_2 = arith.constant 0 : index
    %c0_3 = arith.constant 0 : index
    %2 = vector.load %arg3[%c0_2, %c0_3] : memref<32x4xf32, #tpu.memory_space<vmem>>, vector<32x4xf32>
    %cst = arith.constant dense<0.000000e+00> : vector<32x256xf32>
    %3 = tpu.matmul %2, %1, %cst {dimension_numbers = #tpu.dot_dimension_numbers<[1], [0], [0], [1], [0, 0, 1, 1], [], []>} : vector<32x4xf32>, vector<4x256xf32>, vector<32x256xf32> -> vector<32x256xf32>
    %c0_4 = arith.constant 0 : index
    %c0_5 = arith.constant 0 : index
    %4 = vector.load %arg4[%c0_4, %c0_5] : memref<32x1xf32, #tpu.memory_space<vmem>>, vector<32x1xf32>
    %5 = vector.broadcast %4 : vector<32x1xf32> to vector<32x256xf32>
    %6 = arith.addf %3, %5 : vector<32x256xf32>
    %cst_6 = arith.constant 0.000000e+00 : f32
    %7 = vector.broadcast %cst_6 : f32 to vector<32x256xf32>
    %8 = arith.maximumf %6, %7 : vector<32x256xf32>
    %c0_7 = arith.constant 0 : index
    %c0_8 = arith.constant 0 : index
    %9 = vector.load %arg5[%c0_7, %c0_8] : memref<4x32xf32, #tpu.memory_space<vmem>>, vector<4x32xf32>
    %cst_9 = arith.constant dense<0.000000e+00> : vector<4x256xf32>
    %10 = tpu.matmul %9, %8, %cst_9 {dimension_numbers = #tpu.dot_dimension_numbers<[1], [0], [0], [1], [0, 0, 1, 1], [], []>} : vector<4x32xf32>, vector<32x256xf32>, vector<4x256xf32> -> vector<4x256xf32>
    %c0_10 = arith.constant 0 : index
    %c0_11 = arith.constant 0 : index
    %11 = vector.load %arg6[%c0_10, %c0_11] : memref<4x1xf32, #tpu.memory_space<vmem>>, vector<4x1xf32>
    %12 = vector.broadcast %11 : vector<4x1xf32> to vector<4x256xf32>
    %13 = arith.addf %10, %12 : vector<4x256xf32>
    %c0_12 = arith.constant 0 : index
    %c0_13 = arith.constant 0 : index
    %c0_14 = arith.constant 0 : index
    %14 = vector.load %arg7[%c0_12, %c0_13, %c0_14] : memref<1x4x256xf32, #tpu.memory_space<vmem>>, vector<1x4x256xf32>
    %15 = vector.shape_cast %14 : vector<1x4x256xf32> to vector<4x256xf32>
    %16 = vector.shape_cast %13 : vector<4x256xf32> to vector<1x4x256xf32>
    tpu.vector_store %arg7[%c0_12, %c0_13, %c0_14], %16 {strides = array<i32>} : memref<1x4x256xf32, #tpu.memory_space<vmem>>, vector<1x4x256xf32>,
    return
  }
  func.func @transform_0(%arg0: i32, %arg1: i32) -> (i32, i32, i32) {
    %c0_i32 = arith.constant 0 : i32
    %c0_i32_0 = arith.constant 0 : i32
    return %arg0, %c0_i32, %arg1 : i32, i32, i32
  }
  func.func @transform_1(%arg0: i32, %arg1: i32) -> (i32, i32) {
    %c0_i32 = arith.constant 0 : i32
    %c0_i32_0 = arith.constant 0 : i32
    %c0_i32_1 = arith.constant 0 : i32
    return %c0_i32, %c0_i32_0 : i32, i32
  }
  func.func @transform_2(%arg0: i32, %arg1: i32) -> (i32, i32) {
    %c0_i32 = arith.constant 0 : i32
    %c0_i32_0 = arith.constant 0 : i32
    %c0_i32_1 = arith.constant 0 : i32
    return %c0_i32, %c0_i32_0 : i32, i32
  }
  func.func @transform_3(%arg0: i32, %arg1: i32) -> (i32, i32) {
    %c0_i32 = arith.constant 0 : i32
    %c0_i32_0 = arith.constant 0 : i32
    %c0_i32_1 = arith.constant 0 : i32
    return %c0_i32, %c0_i32_0 : i32, i32
  }
  func.func @transform_4(%arg0: i32, %arg1: i32) -> (i32, i32) {
    %c0_i32 = arith.constant 0 : i32
    %c0_i32_0 = arith.constant 0 : i32
    %c0_i32_1 = arith.constant 0 : i32
    return %c0_i32, %c0_i32_0 : i32, i32
  }
  func.func @transform_5(%arg0: i32, %arg1: i32) -> (i32, i32, i32) {
    %c0_i32 = arith.constant 0 : i32
    %c0_i32_0 = arith.constant 0 : i32
    return %arg0, %c0_i32, %arg1 : i32, i32, i32
  }
}

</mosaic_0001>

<bundles_post_ra>
// kernel: tpu_custom_call.1
= control target key start
LH: loop header
LB: loop body
LE: loop exit
PB: predicated region body
PF: predicated region fallthrough
CT: control target
= control target key end

     0   :  { %10 = vsyncpa [#allocation3], 0  ;;  %s862_s0 = inlined_call_operand.vmem [shape: f32[2,4,256], index: 0, kind: input, shape index: {}]   ;;  %s863_s1 = inlined_call_operand.vmem [shape: f32[32,4], index: 1, kind: input, shape index: {}]   ;;  %s864_s2 = inlined_call_operand.vmem [shape: f32[32,1], index: 2, kind: input, shape index: {}]   ;;  %s865_s3 = inlined_call_operand.vmem [shape: f32[4,32], index: 3, kind: input, shape index: {}]   ;;  %s866_s4 = inlined_call_operand.vmem [shape: f32[4,1], index: 4, kind: input, shape index: {}]   ;;  %s867_s5 = inlined_call_operand.hbm [shape: f32[2,4,256], index: 5, kind: output, shape index: {}]  }
   0x1   :  { %12 = vsyncpa [#allocation3 + $0x1], 0  ;;  %s722_s18 = smov 0   ;;  %s724_s19 = smov 0  }
   0x2   :  { %s726_s20 = smov 0   ;;  %s728_s21 = smov 0  }
   0x3   :  { %s730_s22 = smov 0   ;;  %s732_s23 = smov 0  }
   0x4 LB: > { %s523_s24 = sadd.s32 4294967295, %s689_s23   ;;  %s524_s25 = sadd.s32 4294967294, %s689_s23   ;;  %s689_s23 = sphi %s732_s23, %s18_s23   ;;  %s685_s22 = sphi %s730_s22, %s874_s22   ;;  %s681_s21 = sphi %s728_s21, %s873_s21   ;;  %s677_s20 = sphi %s726_s20, %s872_s20   ;;  %s673_s19 = sphi %s724_s19, %s871_s19   ;;  %s669_s18 = sphi %s722_s18, %s870_s18  }
   0x5   : > { %s30_s26 = sadd.s32 1, %s685_s22  ;;  %s151_s27 = sadd.s32 1, %s677_s20 }
   0x6   : > { %p32_p0 = scmp.ge.s32.totalorder %s30_s26, 2  ;;  %p161_p1 = scmp.ne.s32.totalorder %s677_s20, %s673_s19 }
   0x7   : > { %p162_p2 = scmp.eq.s32.totalorder %s523_s24, 1  ;;  %p167_p3 = scmp.ne.s32.totalorder %s673_s19, %s669_s18 }
   0x8   : > { %s876_s26 = smov (%p32_p0, %s30_s26), 0  ;;  %p168_p5 = scmp.eq.s32.totalorder %s524_s25, 1 }
   0x9   : > { %p762_p4 = por %p162_p2, %p161_p1  ;;  %s146_s29 = ssub.s32 %s685_s22, %s876_s26 }
   0xa   : > { %p527_p6 = scmp.ge.s32.totalorder %s689_s23, 1  ;;  %p149_p7 = scmp.eq.s32.totalorder %s146_s29, 0 }
   0xb   : > { %p769_p8 = por %p168_p5, %p167_p3  ;;  %p211_p9 = scmp.lt.s32.totalorder %s689_s23, 3 }
   0xc   : > { %s775_s6 = scalar_select %p149_p7, %s677_s20, %s151_s27  }
   0xd   : > { %p212_p10 = pnand %p527_p6, %p211_p9 }
   0xe   : > { %p244_p11 = scmp.lt.s32.totalorder (!%p212_p10), %s681_s21, 1  ;;  %s240_s17 = sand.u32 (!%p212_p10), 1, %s673_s19  }
   0xf   : > { %215 = sbr.rel (%p212_p10) target bundleno = 326 (0x146), region = 40  ;;  %s528_s24 = sshll.u32 (!%p212_p10), %s240_s17, 3 }
  0x10   : > { %s549_s25 = sshll.u32 (!%p212_p10), %s681_s21, 3  ;;  %s242_s8 = scalar_lea.vmem (!%p212_p10), [#allocation2], %s528_s24 }
  0x11   : > { %s442_s7 = scalar_lea.hbm (!%p212_p10), %s867_s5, %s549_s25  ;;  %s444_s9 = sshll.u32 (!%p212_p10), %s242_s8, 4  ;;  %s445_s9 = int_to_ptr.vmem [resolvable:$true] %s444_s9 }
  0x12   : > { %s446_s10 = sshll.u32 (!%p212_p10), %s442_s7, 4  ;;  %s447_s10 = int_to_ptr.hbm [resolvable:$true] %s446_s10 }
  0x14   : > { %v691_v0 = vmov 0   ;;  %v260_v1 = vld [vmem:[%s864_s2 + $0x8] sm:$0xff]  ;;  %v262_v2 = vld [vmem:[%s864_s2 + $0x18] sm:$0xff]  ;;  %s245_s11 = scalar_select %p244_p11, %s681_s21, 1  ;;  %v259_v4 = vld [vmem:[%s864_s2] sm:$0xff]  ;;  %vm300_vm0 = vcmask 1043456  }
  0x15   : > { %609 = vset.pattern.permute.xlu1 %v691_v0  ;;  %608 = vset.pattern.permute.xlu0 %v691_v0  ;;  %v261_v5 = vld [vmem:[%s864_s2 + $0x10] sm:$0xff]  ;;  %v255_v6 = vld [vmem:[%s863_s1] sm:$0xff]  ;;  %vm287_vm1 = vcmask 31744   ;;  %v258_v9 = vld [vmem:[%s863_s1 + $0x18] sm:$0xff]  ;;  %vm378_vm2 = vcmask 261120   ;;  %s429_s21 = scalar_lea.sflag [#allocation3], %s240_s17 }
  0x16   : > { %270 = vperm.xlu1 %609, %v260_v1   ;;  %280 = vperm.xlu0 %608, %v262_v2   ;;  %s548_s12 = sshll.u32 %s245_s11, 3  ;;  %v256_v10 = vld [vmem:[%s863_s1 + $0x8] sm:$0xff]  ;;  %v257_v11 = vld [vmem:[%s863_s1 + $0x10] sm:$0xff]  ;;  %v372_v12 = vld [vmem:[%s866_s4] sm:$0xf]  ;;  %s625_s11 = sshra.s32 %s447_s10, 4  ;;  %s626_s11 = int_to_ptr.hbm [resolvable:$true] %s625_s11 }
  0x17   : > { %610 = vset.pattern.permute.xlu2 %v691_v0  ;;  %s251_s15 = scalar_lea.vmem %s862_s0, %s548_s12  ;;  %v371_v40 = vld [vmem:[%s865_s3] sm:$0xf]  ;;  %s627_s12 = scalar_lea.hbm %s626_s11, 8 }
  0x18   : > { %v254_v3 = vld [vmem:[%s251_s15] sm:$0xff]  ;;  %375 = vperm.xlu2 %610, %v372_v12   ;;  %p628_p12 = scmp.ne.s32.totalorder %s626_s11, %s627_s12  ;;  %s631_s15 = scalar_lea.hbm %s867_s5, 16 }
  0x19   : > { %284 = vst [vmem:[#allocation1] ss:$2 sm:$0xff] %v254_v3  ;;  %p632_p1 = scmp.lt.s32.totalorder %s626_s11, %s867_s5  ;;  %p633_p2 = scmp.lt.s32.totalorder %s631_s15, %s627_s12 }
  0x1a   : > { %p629_p13 = pnand %p628_p12, %p762_p4 }
  0x1b   : > { %p634_p3 = por %p633_p2, %p632_p1 }
  0x1c   : > { %p630_p0 = pneg %p629_p13 }
  0x1e   : > { %265 = vperm.xlu1 %609, %v259_v4   ;;  %275 = vperm.xlu0 %608, %v261_v5   ;;  %p635_p5 = pnand %p634_p3, %p630_p0 }
  0x20   : > { %v285_v7 = vld.sshfl [vmem:[#allocation1] sm:$0xff pattern:$0x75316420]  ;;  %v286_v8 = vld.sshfl [vmem:[#allocation1 + $0x8] sm:$0xff pattern:$0x75316420] }
  0x21   : > { %531 = vmatpush.msk.msra.mxu0 %vm300_vm0, %v285_v7  ;;  %536 = vmatpush.msk.msra.mxu1 %vm300_vm0, %v286_v8 }
  0x22   : > { %532 = vmatmul.msk.f32.vlgmr.msra.gmra.mxu0 %vm287_vm1, %v255_v6  ;;  %537 = vmatmul.msk.f32.vlgmr.msra.gmra.mxu1 %vm287_vm1, %v255_v6 }
  0x23   : > { %550 = vmatpush.msk.msra.mxu2 %vm300_vm0, %v285_v7  ;;  %551 = vmatpush.msk.msra.mxu3 %vm300_vm0, %v286_v8 }
  0x24   : > { %535 = vmatmul.msk.f32.vlgmr.msra.gmra.mxu2 %vm287_vm1, %v258_v9  ;;  %540 = vmatmul.msk.f32.vlgmr.msra.gmra.mxu3 %vm287_vm1, %v258_v9 }
  0x2a   : > { %533 = vmatmul.msk.f32.gmra.mxu0 %vm287_vm1, %v256_v10  ;;  %538 = vmatmul.msk.f32.gmra.mxu1 %vm287_vm1, %v256_v10 }
  0x32   : > { %534 = vmatmul.msk.f32.gmra.mxu0 %vm287_vm1, %v257_v11  ;;  %539 = vmatmul.msk.f32.gmra.mxu1 %vm287_vm1, %v257_v11 }
  0x72   : > { %v376_v42 = vpop.permute.xlu2 %375 }
  0x88   : > { %v281_v15 = vpop.permute.xlu0 %280  ;;  %v271_v16 = vpop.permute.xlu1 %270 }
  0x90   : > { %v276_v25 = vpop.permute.xlu0 %275  ;;  %v266_v27 = vpop.permute.xlu1 %265 }
  0x9f   : > { %v322_v13 = vpop.f32.mrf.mxu0  ;;  %v351_v14 = vpop.f32.mrf.mxu1 }
  0xa0   : > { %v323_v33 = vadd.f32 %v322_v13, %v266_v27  ;;  %v352_v35 = vadd.f32 %v351_v14, %v266_v27 }
  0xa2   : > { %v363_v39 = vmax.f32 %v323_v33, 0.0  ;;  %v364_v41 = vmax.f32 %v352_v35, 0.0 }
  0xa7   : > { %v325_v17 = vpop.f32.mrf.mxu0  ;;  %v331_v18 = vpop.f32.mrf.mxu2 }
  0xa8   : > { %v332_v19 = vadd.f32 %v331_v18, %v281_v15  ;;  %v354_v20 = vpop.f32.mrf.mxu1  ;;  %v360_v21 = vpop.f32.mrf.mxu3  ;;  %v326_v28 = vadd.f32 %v325_v17, %v271_v16 }
  0xa9   : > { %v361_v22 = vadd.f32 %v360_v21, %v281_v15  ;;  %v355_v31 = vadd.f32 %v354_v20, %v271_v16 }
  0xaa   : > { %v369_v23 = vmax.f32 %v332_v19, 0.0  ;;  %v365_v37 = vmax.f32 %v326_v28, 0.0 }
  0xab   : > { %v370_v24 = vmax.f32 %v361_v22, 0.0  ;;  %v366_v38 = vmax.f32 %v355_v31, 0.0 }
  0xac   : > { %394 = vmatpush.msrb.mxu2 %v369_v23 }
  0xad   : > { %414 = vmatpush.msrb.mxu3 %v370_v24 }
  0xaf   : > { %v328_v26 = vpop.f32.mrf.mxu0 }
  0xb0   : > { %v329_v29 = vadd.f32 %v328_v26, %v276_v25  ;;  %v357_v30 = vpop.f32.mrf.mxu1 }
  0xb1   : > { %v358_v32 = vadd.f32 %v357_v30, %v276_v25 }
  0xb2   : > { %v367_v34 = vmax.f32 %v329_v29, 0.0 }
  0xb3   : > { %v368_v36 = vmax.f32 %v358_v32, 0.0 }
  0xb4   : > { %395 = vmatpush.msrb.mxu2 %v367_v34 }
  0xb5   : > { %415 = vmatpush.msrb.mxu3 %v368_v36 }
  0xb6   : > { %396 = vmatpush.msrb.mxu2 %v365_v37 }
  0xb7   : > { %416 = vmatpush.msrb.mxu3 %v366_v38 }
  0xb8   : > { %397 = vmatpush.msrb.mxu2 %v363_v39 }
  0xb9   : > { %417 = vmatpush.msrb.mxu3 %v364_v41  ;;  %541 = vmatmul.msk.f32.vlgmr.msrb.gmra.mxu2 %vm378_vm2, %v371_v40 }
  0xba   : > { %542 = vmatmul.msk.f32.vlgmr.msrb.gmra.mxu3 %vm378_vm2, %v371_v40 }
 0x13c   : > { %v399_v44 = vpop.f32.mrf.mxu2 }
 0x13d   : > { %v419_v43 = vpop.f32.mrf.mxu3  ;;  %v400_v47 = vadd.f32 %v399_v44, %v376_v42 }
 0x13e   : > { %v420_v45 = vadd.f32 %v419_v43, %v376_v42 }
 0x140   : > { %v424_v46 = vrot.slane %v420_v45, 4 }
 0x142   : > { %v425_v48 = vsel %vm300_vm0, %v400_v47, %v424_v46 }
 0x143   : > { %427 = vst [vmem:[%s242_s8] sm:$0xff] %v425_v48 }
 0x144   : > { %638 = shalt.err (!%p635_p5)
}
 0x145   : > { %552 = dma.vmem_to_hbm [thread:$0]  (%p762_p4), %s445_s9, 128, %s447_s10, %s429_s21  }
 0x146 PF: > { %p558_p6 = scmp.ge.s32.totalorder %s689_s23, 2  ;;  %s458_s17 = sand.u32 1, %s669_s18  }
 0x147   : > { %s459_s25 = scalar_lea.sflag [#allocation3], %s458_s17 }
 0x148   : > { %p555_p7 = pnand %p558_p6, %p769_p8 }
 0x14a   : > { %p556_p9 = pneg %p555_p7 }
 0x14c   : > { %664 = dma.done.wait (%p556_p9), %s459_s25, 128  }
 0x14d   : > { %666 = vsyncadd (%p556_p9), %s459_s25, 4294967168  ;;  %s18_s23 = sadd.s32 1, %s689_s23   ;;  %s870_s18 = smov %s673_s19 }
 0x14e   : > { %p15_p10 = scmp.ge.s32.totalorder %s18_s23, 4   ;;  %s871_s19 = smov %s677_s20 }
 0x14f   : > { %s872_s20 = smov %s775_s6  ;;  %s873_s21 = smov %s685_s22 }
 0x150   : > { %s874_s22 = smov %s876_s26  ;;  %17 = sbr.rel (!%p15_p10) target bundleno = 4 (0x4), region = 75 }
 0x155   :  { %465 = vsyncpa [#allocation3], 1 }
 0x156   :  { %467 = vsyncpa [#allocation3 + $0x1], 1 }

</bundles_post_ra>
